<compile_context>
chip_gen: v7x
topology: tpu7x:2x2x1
jax: 0.10.0
libtpu: 0.0.40
codegen_flags: <defaults>
</compile_context>

<pallas_src>
import functools
import numpy as np
import jax
import jax.numpy as jnp
from jax.experimental import pallas as pl
from jax.experimental.pallas import tpu as pltpu

# ---------------- problem sizes (small, consistent with the module) ----------
N       = 2            # batch
CIN     = 3            # image channels
H_IMG   = 16           # image height
W_IMG   = 16           # image width
HWI     = H_IMG * W_IMG
HF = WF = 8            # feature-map spatial size at the grad layer
HW      = HF * WF      # flattened feature spatial
SH      = H_IMG // HF  # pool stride (2)
C_FEAT  = 32           # feature channels at the grad layer (2048 in real resnet50)
K       = 4            # num_classes
LANE    = 128          # lane width for padded logits
THRESH  = 0.8
EPS     = 1e-8


# ---------------- fused kernel --------------------------------------------------
def guide_cnn_kernel(x_ref, wc_ref, pool_ref, wst_ref, bsc_ref, gap_ref,
                     wfcr_ref, bfcc_ref, bmask_ref, up_ref,
                     logits_t_ref, scaled_ref, mask_ref):
    # ---- 2x2 avg pool + batch->lane relayout, on the MXU (block-diag pool) ----
    # x_ref: (N, CIN, HWI) pure reshape of NCHW.  pool_ref: kron(I_N, pool2x2).
    xp = jnp.dot(x_ref[0], pool_ref[pl.ds(0, HWI), :],
                 preferred_element_type=jnp.float32)               # (CIN, N*HW)
    for n in range(1, N):                                          # static, N=2
        xp = xp + jnp.dot(x_ref[n], pool_ref[pl.ds(n * HWI, HWI), :],
                          preferred_element_type=jnp.float32)

    # ---- stem: 1x1 conv as (C_FEAT, CIN)@(CIN, N*HW) -> lane-dense fl^T -------
    flt = jnp.maximum(jnp.dot(wst_ref[...], xp,
                              preferred_element_type=jnp.float32)
                      + bsc_ref[...], 0.0)                         # (C_FEAT, N*HW)

    # ---- GAP on the MXU + fc -> padded logits^T -------------------------------
    pooled_t = jnp.dot(flt, gap_ref[...],
                       preferred_element_type=jnp.float32)          # (C_FEAT, N)
    logits_t_ref[...] = (jnp.dot(wfcr_ref[...], pooled_t,
                                 preferred_element_type=jnp.float32)
                         + bfcc_ref[...])                           # (LANE, N)

    # ---- Grad-CAM: Ac = relu(sum_c wc*fl); cross-image terms masked to 0 ------
    # wc_ref = w_fc[labels]/HW precomputed in the wrapper (the analytic backward
    # hook of sum(logits*ohe) followed by adaptive_avg_pool2d(.,1)).
    ac = jnp.maximum(jnp.dot(wc_ref[...], flt,
                             preferred_element_type=jnp.float32), 0.0)
    ac = ac * bmask_ref[...]                                        # (N, N*HW)

    # ---- bilinear upsample (align_corners=True) folded into one matmul --------
    up = jnp.dot(ac, up_ref[...], preferred_element_type=jnp.float32)   # (N, HWI)

    # ---- per-image min-max normalization + 0.8 double-threshold ---------------
    smin = jnp.min(up, axis=1, keepdims=True)
    smax = jnp.max(up, axis=1, keepdims=True)
    scaled = (up - smin) * pl.reciprocal(smax - smin + EPS, approx=False)
    mask = jnp.where(scaled > THRESH, 1.0, scaled)
    mask = jnp.where(mask < THRESH, 0.0, mask)

    scaled_ref[...] = scaled                                        # (N, HWI)
    mask_ref[...] = mask                                            # (N, HWI)


def _guide_cnn_pallas(x3, wc, pool_blk, ws_t, bs_col, gap_blk,
                      wfc_rows, bfc_col, blk_mask, up_tiled):
    # Single grid-less invocation; every operand is a whole-array VMEM block
    # (total working set < 0.5 MiB).
    # TODO(synk): when scaling to real ResNet-50 sizes, switch to a batch grid
    # with dimension_semantics=("parallel",) so v7x's two TensorCores split it,
    # and tile C_FEAT / the upsample instead of keeping the whole batch resident.
    n_in = 10
    return pl.pallas_call(
        guide_cnn_kernel,
        out_shape=(
            jax.ShapeDtypeStruct((LANE, N), jnp.float32),   # padded logits^T
            jax.ShapeDtypeStruct((N, HWI), jnp.float32),    # scaled CAM (flat)
            jax.ShapeDtypeStruct((N, HWI), jnp.float32),    # thresholded mask (flat)
        ),
        in_specs=[pl.BlockSpec(memory_space=pltpu.MemorySpace.VMEM)
                  for _ in range(n_in)],
        out_specs=(pl.BlockSpec(memory_space=pltpu.MemorySpace.VMEM),
                   pl.BlockSpec(memory_space=pltpu.MemorySpace.VMEM),
                   pl.BlockSpec(memory_space=pltpu.MemorySpace.VMEM)),
        cost_estimate=pl.CostEstimate(flops=620_000, transcendentals=2 * N,
                                      bytes_accessed=440_000),
    )(x3, wc, pool_blk, ws_t, bs_col, gap_blk, wfc_rows, bfc_col, blk_mask, up_tiled)


# ---------------- host-side constants (numpy, built ONCE) ----------------------
def _interp_matrix(out_len, in_len):
    """align_corners=True bilinear interpolation matrix (out_len x in_len)."""
    coords = np.arange(out_len, dtype=np.float64) * (in_len - 1) / max(out_len - 1, 1)
    lo = np.floor(coords).astype(np.int64)
    hi = np.minimum(lo + 1, in_len - 1)
    frac = coords - lo
    m = np.zeros((out_len, in_len), dtype=np.float32)
    m[np.arange(out_len), lo] += (1.0 - frac).astype(np.float32)
    m[np.arange(out_len), hi] += frac.astype(np.float32)
    return m


@functools.lru_cache(maxsize=None)
def _upsample_matrix():
    """(HW, H_IMG*W_IMG) bilinear-upsample matrix: up = ac_flat @ U."""
    rh = _interp_matrix(H_IMG, HF)     # rows  -> image height
    rw = _interp_matrix(W_IMG, WF)     # cols  -> image width
    return np.ascontiguousarray(np.kron(rh, rw).T.astype(np.float32))


@functools.lru_cache(maxsize=None)
def _pool_matrix():
    """(HWI, HW) 2x2 average-pool matrix (applied on the MXU)."""
    m = np.zeros((HWI, HW), dtype=np.float32)
    inv = 1.0 / (SH * SH)
    for y in range(H_IMG):
        for x in range(W_IMG):
            m[y * W_IMG + x, (y // SH) * WF + (x // SH)] = inv
    return m


def _make_packed(w_stem, b_stem, w_fc, b_fc):
    """One-time numpy packing of parameters + constant matrices."""
    w_stem = np.asarray(w_stem, np.float32)
    b_stem = np.asarray(b_stem, np.float32)
    w_fc = np.asarray(w_fc, np.float32)
    b_fc = np.asarray(b_fc, np.float32)
    eye_n = np.eye(N, dtype=np.float32)

    packed = {
        # stem weights, transposed for lane-dense fl^T = ws^T @ x
        "ws_t":     np.ascontiguousarray(w_stem.T),                      # (C_FEAT, CIN)
        "bs_col":   b_stem.reshape(C_FEAT, 1),                           # (C_FEAT, 1)
        # fc weight padded to the 128-lane axis, as rows for logits^T = W @ pooled^T
        "wfc_rows": np.zeros((LANE, C_FEAT), np.float32),                # (LANE, C_FEAT)
        "bfc_col":  np.zeros((LANE, 1), np.float32),                     # (LANE, 1)
        # block-diagonal 2x2-pool (folds the batch->lane relayout into the MXU)
        "pool_blk": np.kron(eye_n, _pool_matrix()),                      # (N*HWI, N*HW)
        # per-image global-average-pool on the MXU
        "gap_blk":  np.kron(eye_n, np.full((HW, 1), 1.0 / HW, np.float32)),  # (N*HW, N)
        # zero-out cross-image terms of the CAM matmul
        "blk_mask": np.kron(eye_n, np.ones((1, HW), np.float32)),        # (N, N*HW)
        # bilinear upsample matrix, tiled per image
        "up_tiled": np.concatenate([_upsample_matrix()] * N, axis=0),    # (N*HW, HWI)
    }
    packed["wfc_rows"][:K, :] = w_fc
    packed["bfc_col"][:K, 0] = b_fc.reshape(K)
    return packed


# ---------------- device forward (single XLA program) ---------------------------
def make_guide_cnn_forward(w_stem, b_stem, w_fc, b_fc):
    packed = {k: jnp.asarray(v) for k, v in _make_packed(w_stem, b_stem,
                                                         w_fc, b_fc).items()}
    w_fc_dev = jnp.asarray(w_fc, jnp.float32)

    @jax.jit
    def device_forward(images, labels):
        # pure reshape of NCHW -> (N, CIN, HWI); no transpose, no pooling HLOs.
        x3 = images.reshape(N, CIN, HWI).astype(jnp.float32)
        # analytic backward hook of sum(logits*ohe): wc = w_fc[labels] / (H*W)
        wc = w_fc_dev[labels] * (1.0 / HW)                               # (N, C_FEAT)

        logits_t, scaled_flat, mask_flat = _guide_cnn_pallas(
            x3, wc, packed["pool_blk"], packed["ws_t"], packed["bs_col"],
            packed["gap_blk"], packed["wfc_rows"], packed["bfc_col"],
            packed["blk_mask"], packed["up_tiled"])

        logits = logits_t[:K, :].T                                       # (N, K)
        scaled = scaled_flat.reshape(N, H_IMG, W_IMG)
        mask = mask_flat.reshape(N, H_IMG, W_IMG)
        return logits, scaled, mask

    return device_forward


def guide_cnn_forward(device_forward, images, labels, images_size):
    """Training-mode forward of Guide_CNN: returns (logits, BOX, scaled_cam)."""
    logits, scaled, mask = device_forward(images, labels)

    # host glue: box extraction (approximation of cv2 largest-contour boundingRect)
    mask_np = np.asarray(jax.device_get(mask))
    sizes_np = np.asarray(jax.device_get(images_size))
    boxes = []
    for i in range(mask_np.shape[0]):
        score_map = mask_np[i].astype(np.uint8)                          # (H, W)
        if score_map.any():
            rows = np.any(score_map > 0, axis=1)
            cols = np.any(score_map > 0, axis=0)
            y_idx = np.where(rows)[0]
            x_idx = np.where(cols)[0]
            x0 = int(x_idx.min()); y0 = int(y_idx.min())
            w = int(x_idx.max()) - x0 + 1
            h = int(y_idx.max()) - y0 + 1
            x1 = min(x0 + w, int(sizes_np[i, 0, 0]))
            y1 = min(y0 + h, int(sizes_np[i, 0, 1]))
            boxes.append(jnp.asarray([[x0, y0, x1, y1]], dtype=jnp.float32))
        else:
            boxes.append(jnp.zeros((0, 4), dtype=jnp.float32))
    return logits, boxes, scaled


if __name__ == "__main__":
    key = jax.random.PRNGKey(0)
    k_img, k_ws, k_bs, k_wfc, k_bfc, k_lab = jax.random.split(key, 6)

    images = jax.random.normal(k_img, (N, CIN, H_IMG, W_IMG), dtype=jnp.float32)
    labels = jax.random.randint(k_lab, (N,), 0, K)
    images_size = jnp.full((N, 1, 2), H_IMG, dtype=jnp.int32)

    # deterministic synthetic parameters
    w_stem = 0.3 * jax.random.normal(k_ws, (CIN, C_FEAT), dtype=jnp.float32)
    b_stem = 0.1 * jax.random.normal(k_bs, (1, C_FEAT), dtype=jnp.float32)
    w_fc   = 0.3 * jax.random.normal(k_wfc, (K, C_FEAT), dtype=jnp.float32)
    b_fc   = 0.1 * jax.random.normal(k_bfc, (1, K), dtype=jnp.float32)

    fwd = make_guide_cnn_forward(w_stem, b_stem, w_fc, b_fc)
    logits, boxes, scaled = guide_cnn_forward(fwd, images, labels, images_size)

    jax.block_until_ready(logits)
    jax.block_until_ready(scaled)
    for b in boxes:
        jax.block_until_ready(b)

    # ---- numpy float64 reference of the same fused math (plumbing validation) --
    img_np = np.asarray(images, np.float64)
    ws_np = np.asarray(w_stem, np.float64)
    bs_np = np.asarray(b_stem, np.float64)
    wfc_np = np.asarray(w_fc, np.float64)
    bfc_np = np.asarray(b_fc, np.float64)
    lab_np = np.asarray(labels)

    xp_np = img_np.reshape(N, CIN, HF, SH, WF, SH).mean(axis=(3, 5)).reshape(N, CIN, HW)
    fl_np = np.maximum(np.einsum("ncp,cf->nfp", xp_np, ws_np)
                       + bs_np.reshape(1, C_FEAT, 1), 0.0)
    pooled_np = fl_np.mean(axis=2)
    logits_np = pooled_np @ wfc_np.T + bfc_np.reshape(K)
    wc_np = wfc_np[lab_np] / HW
    ac_np = np.maximum(np.einsum("nfp,nf->np", fl_np, wc_np), 0.0)
    up_np = ac_np @ np.asarray(_upsample_matrix(), np.float64)
    smin = up_np.min(axis=1, keepdims=True)
    smax = up_np.max(axis=1, keepdims=True)
    scaled_np = ((up_np - smin) / (smax - smin + EPS)).reshape(N, H_IMG, W_IMG)

    assert logits.shape == (N, K)
    assert scaled.shape == (N, H_IMG, W_IMG)
    assert bool(jnp.all(jnp.isfinite(scaled)))
    assert np.allclose(np.asarray(logits), logits_np, atol=3e-2, rtol=3e-2)
    assert np.allclose(np.asarray(scaled), scaled_np, atol=3e-2, rtol=3e-2)
    print("KERNEL_OK")
</pallas_src>

<mosaic_0001>
module attributes {stable_mosaic.version = 11 : i64} {
  func.func @guide_cnn_kernel(%arg0: memref<2x3x256xf32, #tpu.memory_space<vmem>>, %arg1: memref<2x32xf32, #tpu.memory_space<vmem>>, %arg2: memref<512x128xf32, #tpu.memory_space<vmem>>, %arg3: memref<32x3xf32, #tpu.memory_space<vmem>>, %arg4: memref<32x1xf32, #tpu.memory_space<vmem>>, %arg5: memref<128x2xf32, #tpu.memory_space<vmem>>, %arg6: memref<128x32xf32, #tpu.memory_space<vmem>>, %arg7: memref<128x1xf32, #tpu.memory_space<vmem>>, %arg8: memref<2x128xf32, #tpu.memory_space<vmem>>, %arg9: memref<128x256xf32, #tpu.memory_space<vmem>>, %arg10: memref<128x2xf32, #tpu.memory_space<vmem>>, %arg11: memref<2x256xf32, #tpu.memory_space<vmem>>, %arg12: memref<2x256xf32, #tpu.memory_space<vmem>>) attributes {dimension_semantics = [], scalar_prefetch = 0 : i64, scratch_operands = 0 : i64, tpu.core_type = #tpu.core_type<tc>} {
    %c0 = arith.constant 0 : index
    %c0_0 = arith.constant 0 : index
    %c0_1 = arith.constant 0 : index
    %0 = vector.load %arg0[%c0, %c0_0, %c0_1] : memref<2x3x256xf32, #tpu.memory_space<vmem>>, vector<1x3x256xf32>
    %1 = vector.shape_cast %0 : vector<1x3x256xf32> to vector<3x256xf32>
    %c0_2 = arith.constant 0 : index
    %c0_3 = arith.constant 0 : index
    %2 = vector.load %arg2[%c0_2, %c0_3] : memref<512x128xf32, #tpu.memory_space<vmem>>, vector<256x128xf32>
    %cst = arith.constant dense<0.000000e+00> : vector<3x128xf32>
    %3 = tpu.matmul %1, %2, %cst {dimension_numbers = #tpu.dot_dimension_numbers<[1], [0], [0], [1], [0, 0, 1, 1], [], []>} : vector<3x256xf32>, vector<256x128xf32>, vector<3x128xf32> -> vector<3x128xf32>
    %c1 = arith.constant 1 : index
    %c0_4 = arith.constant 0 : index
    %c0_5 = arith.constant 0 : index
    %4 = vector.load %arg0[%c1, %c0_4, %c0_5] : memref<2x3x256xf32, #tpu.memory_space<vmem>>, vector<1x3x256xf32>
    %5 = vector.shape_cast %4 : vector<1x3x256xf32> to vector<3x256xf32>
    %c256 = arith.constant 256 : index
    %c0_6 = arith.constant 0 : index
    %6 = vector.load %arg2[%c256, %c0_6] : memref<512x128xf32, #tpu.memory_space<vmem>>, vector<256x128xf32>
    %cst_7 = arith.constant dense<0.000000e+00> : vector<3x128xf32>
    %7 = tpu.matmul %5, %6, %cst_7 {dimension_numbers = #tpu.dot_dimension_numbers<[1], [0], [0], [1], [0, 0, 1, 1], [], []>} : vector<3x256xf32>, vector<256x128xf32>, vector<3x128xf32> -> vector<3x128xf32>
    %8 = arith.addf %3, %7 : vector<3x128xf32>
    %c0_8 = arith.constant 0 : index
    %c0_9 = arith.constant 0 : index
    %9 = vector.load %arg3[%c0_8, %c0_9] : memref<32x3xf32, #tpu.memory_space<vmem>>, vector<32x3xf32>
    %cst_10 = arith.constant dense<0.000000e+00> : vector<32x128xf32>
    %10 = tpu.matmul %9, %8, %cst_10 {dimension_numbers = #tpu.dot_dimension_numbers<[1], [0], [0], [1], [0, 0, 1, 1], [], []>} : vector<32x3xf32>, vector<3x128xf32>, vector<32x128xf32> -> vector<32x128xf32>
    %c0_11 = arith.constant 0 : index
    %c0_12 = arith.constant 0 : index
    %11 = vector.load %arg4[%c0_11, %c0_12] : memref<32x1xf32, #tpu.memory_space<vmem>>, vector<32x1xf32>
    %12 = vector.broadcast %11 : vector<32x1xf32> to vector<32x128xf32>
    %13 = arith.addf %10, %12 : vector<32x128xf32>
    %cst_13 = arith.constant 0.000000e+00 : f32
    %14 = vector.broadcast %cst_13 : f32 to vector<32x128xf32>
    %15 = arith.maximumf %13, %14 : vector<32x128xf32>
    %c0_14 = arith.constant 0 : index
    %c0_15 = arith.constant 0 : index
    %16 = vector.load %arg5[%c0_14, %c0_15] : memref<128x2xf32, #tpu.memory_space<vmem>>, vector<128x2xf32>
    %cst_16 = arith.constant dense<0.000000e+00> : vector<32x2xf32>
    %17 = tpu.matmul %15, %16, %cst_16 {dimension_numbers = #tpu.dot_dimension_numbers<[1], [0], [0], [1], [0, 0, 1, 1], [], []>} : vector<32x128xf32>, vector<128x2xf32>, vector<32x2xf32> -> vector<32x2xf32>
    %c0_17 = arith.constant 0 : index
    %c0_18 = arith.constant 0 : index
    %18 = vector.load %arg6[%c0_17, %c0_18] : memref<128x32xf32, #tpu.memory_space<vmem>>, vector<128x32xf32>
    %cst_19 = arith.constant dense<0.000000e+00> : vector<128x2xf32>
    %19 = tpu.matmul %18, %17, %cst_19 {dimension_numbers = #tpu.dot_dimension_numbers<[1], [0], [0], [1], [0, 0, 1, 1], [], []>} : vector<128x32xf32>, vector<32x2xf32>, vector<128x2xf32> -> vector<128x2xf32>
    %c0_20 = arith.constant 0 : index
    %c0_21 = arith.constant 0 : index
    %20 = vector.load %arg7[%c0_20, %c0_21] : memref<128x1xf32, #tpu.memory_space<vmem>>, vector<128x1xf32>
    %21 = vector.broadcast %20 : vector<128x1xf32> to vector<128x2xf32>
    %22 = arith.addf %19, %21 : vector<128x2xf32>
    %c0_22 = arith.constant 0 : index
    %c0_23 = arith.constant 0 : index
    %23 = vector.load %arg10[%c0_22, %c0_23] : memref<128x2xf32, #tpu.memory_space<vmem>>, vector<128x2xf32>
    tpu.vector_store %arg10[%c0_22, %c0_23], %22 {strides = array<i32>} : memref<128x2xf32, #tpu.memory_space<vmem>>, vector<128x2xf32>,
    %c0_24 = arith.constant 0 : index
    %c0_25 = arith.constant 0 : index
    %24 = vector.load %arg1[%c0_24, %c0_25] : memref<2x32xf32, #tpu.memory_space<vmem>>, vector<2x32xf32>
    %cst_26 = arith.constant dense<0.000000e+00> : vector<2x128xf32>
    %25 = tpu.matmul %24, %15, %cst_26 {dimension_numbers = #tpu.dot_dimension_numbers<[1], [0], [0], [1], [0, 0, 1, 1], [], []>} : vector<2x32xf32>, vector<32x128xf32>, vector<2x128xf32> -> vector<2x128xf32>
    %cst_27 = arith.constant 0.000000e+00 : f32
    %26 = vector.broadcast %cst_27 : f32 to vector<2x128xf32>
    %27 = arith.maximumf %25, %26 : vector<2x128xf32>
    %c0_28 = arith.constant 0 : index
    %c0_29 = arith.constant 0 : index
    %28 = vector.load %arg8[%c0_28, %c0_29] : memref<2x128xf32, #tpu.memory_space<vmem>>, vector<2x128xf32>
    %29 = arith.mulf %27, %28 : vector<2x128xf32>
    %c0_30 = arith.constant 0 : index
    %c0_31 = arith.constant 0 : index
    %30 = vector.load %arg9[%c0_30, %c0_31] : memref<128x256xf32, #tpu.memory_space<vmem>>, vector<128x256xf32>
    %cst_32 = arith.constant dense<0.000000e+00> : vector<2x256xf32>
    %31 = tpu.matmul %29, %30, %cst_32 {dimension_numbers = #tpu.dot_dimension_numbers<[1], [0], [0], [1], [0, 0, 1, 1], [], []>} : vector<2x128xf32>, vector<128x256xf32>, vector<2x256xf32> -> vector<2x256xf32>
    %cst_33 = arith.constant dense<0x7F800000> : vector<2xf32>
    %32 = vector.multi_reduction <minimumf>, %31, %cst_33 [1] : vector<2x256xf32> to vector<2xf32>
    %33 = vector.shape_cast %32 : vector<2xf32> to vector<2x1xf32>
    %cst_34 = arith.constant dense<0xFF800000> : vector<2xf32>
    %34 = vector.multi_reduction <maximumf>, %31, %cst_34 [1] : vector<2x256xf32> to vector<2xf32>
    %35 = vector.shape_cast %34 : vector<2xf32> to vector<2x1xf32>
    %36 = vector.broadcast %33 : vector<2x1xf32> to vector<2x256xf32>
    %37 = arith.subf %31, %36 : vector<2x256xf32>
    %38 = arith.subf %35, %33 : vector<2x1xf32>
    %cst_35 = arith.constant 9.99999993E-9 : f32
    %39 = vector.broadcast %cst_35 : f32 to vector<2x1xf32>
    %40 = arith.addf %38, %39 : vector<2x1xf32>
    %41 = tpu.reciprocal %40 : vector<2x1xf32> -> vector<2x1xf32>
    %42 = vector.broadcast %41 : vector<2x1xf32> to vector<2x256xf32>
    %43 = arith.mulf %37, %42 : vector<2x256xf32>
    %cst_36 = arith.constant 8.000000e-01 : f32
    %44 = vector.broadcast %cst_36 : f32 to vector<2x256xf32>
    %45 = arith.cmpf ogt, %43, %44 : vector<2x256xf32>
    %cst_37 = arith.constant 1.000000e+00 : f32
    %46 = vector.broadcast %cst_37 : f32 to vector<2x256xf32>
    %47 = arith.select %45, %46, %43 : vector<2x256xi1>, vector<2x256xf32>
    %cst_38 = arith.constant 8.000000e-01 : f32
    %48 = vector.broadcast %cst_38 : f32 to vector<2x256xf32>
    %49 = arith.cmpf olt, %47, %48 : vector<2x256xf32>
    %cst_39 = arith.constant 0.000000e+00 : f32
    %50 = vector.broadcast %cst_39 : f32 to vector<2x256xf32>
    %51 = arith.select %49, %50, %47 : vector<2x256xi1>, vector<2x256xf32>
    %c0_40 = arith.constant 0 : index
    %c0_41 = arith.constant 0 : index
    %52 = vector.load %arg11[%c0_40, %c0_41] : memref<2x256xf32, #tpu.memory_space<vmem>>, vector<2x256xf32>
    tpu.vector_store %arg11[%c0_40, %c0_41], %43 {strides = array<i32>} : memref<2x256xf32, #tpu.memory_space<vmem>>, vector<2x256xf32>,
    %c0_42 = arith.constant 0 : index
    %c0_43 = arith.constant 0 : index
    %53 = vector.load %arg12[%c0_42, %c0_43] : memref<2x256xf32, #tpu.memory_space<vmem>>, vector<2x256xf32>
    tpu.vector_store %arg12[%c0_42, %c0_43], %51 {strides = array<i32>} : memref<2x256xf32, #tpu.memory_space<vmem>>, vector<2x256xf32>,
    return
  }
}

</mosaic_0001>

<bundles_post_ra>
// kernel: device_forward.1
= control target key start
LH: loop header
LB: loop body
LE: loop exit
PB: predicated region body
PF: predicated region fallthrough
CT: control target
= control target key end

     0   :  { %18 = vsyncpa [#allocation3], 0  ;;  %s1965_s0 = inlined_call_operand.vmem [shape: f32[2,3,256], index: 0, kind: input, shape index: {}]   ;;  %s1966_s1 = inlined_call_operand.vmem [shape: f32[2,32], index: 1, kind: input, shape index: {}]   ;;  %s1967_s2 = inlined_call_operand.hbm [shape: f32[512,128], index: 2, kind: input, shape index: {}]   ;;  %s1968_s3 = inlined_call_operand.hbm [shape: f32[32,3], index: 3, kind: input, shape index: {}]   ;;  %s1969_s4 = inlined_call_operand.vmem [shape: f32[32,1], index: 4, kind: input, shape index: {}]   ;;  %s1970_s5 = inlined_call_operand.hbm [shape: f32[128,2], index: 5, kind: input, shape index: {}]   ;;  %s1971_s6 = inlined_call_operand.hbm [shape: f32[128,32], index: 6, kind: input, shape index: {}]   ;;  %s1972_s7 = inlined_call_operand.vmem [shape: f32[128,1], index: 7, kind: input, shape index: {}]   ;;  %s1973_s8 = inlined_call_operand.vmem [shape: f32[2,128], index: 8, kind: input, shape index: {}]   ;;  %s1974_s9 = inlined_call_operand.hbm [shape: f32[128,256], index: 9, kind: input, shape index: {}]   ;;  %s1975_s10 = inlined_call_operand.vmem [shape: f32[128,2], index: 10, kind: output, shape index: {0}]   ;;  %s1976_s11 = inlined_call_operand.vmem [shape: f32[2,256], index: 11, kind: output, shape index: {1}]   ;;  %s1977_s12 = inlined_call_operand.vmem [shape: f32[2,256], index: 12, kind: output, shape index: {2}]  }
   0x1   :  { %19 = vsyncpa [#allocation5], 0 }
   0x2   :  { %20 = vsyncpa [#allocation8], 0  ;;  %s1633_s21 = smov [#allocation4]   ;;  %s1634_s23 = smov [#allocation7]  }
   0x3   :  { %s42_s22 = sshll.u32 %s1633_s21, 4  ;;  %s68_s24 = sshll.u32 %s1634_s23, 4  ;;  %s43_s22 = int_to_ptr.vmem [resolvable:$true] %s42_s22  ;;  %s1711_s24 = int_to_ptr.vmem [resolvable:$true] %s68_s24 }
   0x4   :  { %s1517_s27 = scalar_lea.hbm %s1968_s3, 512 }
   0x5   :  { %p1518_p0 = scmp.ne.s32.totalorder %s1968_s3, %s1517_s27  ;;  %p1521_p1 = scmp.lt.u32.totalorder %s1517_s27, %s1968_s3 }
   0x7   :  { %p1523_p2 = pnand %p1521_p1, %p1518_p0 }
   0x9   :  { %1526 = shalt.err (!%p1523_p2)
}
   0xa   :  { %s1527_s14 = scalar_lea.vmem %s43_s22, 512  ;;  %p1532_p4 = scmp.lt.s32.totalorder %s43_s22, %s43_s22 }
   0xb   :  { %p1528_p3 = scmp.ne.s32.totalorder %s43_s22, %s1527_s14  ;;  %p1533_p5 = scmp.lt.s32.totalorder %s1527_s14, %s1527_s14 }
   0xd   :  { %p1534_p6 = por %p1533_p5, %p1532_p4 }
   0xf   :  { %p1535_p7 = pnand %p1534_p6, %p1528_p3 }
  0x11   :  { %1538 = shalt.err (!%p1535_p7)
}
  0x12   :  { %s1635_s15 = smov 128   ;;  %s1636_s16 = smov 8  }
  0x13   :  { %48 = dma.hbm_to_vmem [thread:$0]  %s1968_s3, 512, %s43_s22, [#allocation5], %s1635_s15, %s1635_s15, %s1636_s16  }
  0x14   :  { %s1539_s21 = scalar_lea.hbm %s1971_s6, 2048 }
  0x15   :  { %p1540_p8 = scmp.ne.s32.totalorder %s1971_s6, %s1539_s21  ;;  %p1543_p9 = scmp.lt.u32.totalorder %s1539_s21, %s1971_s6 }
  0x17   :  { %p1545_p10 = pnand %p1543_p9, %p1540_p8 }
  0x19   :  { %1548 = shalt.err (!%p1545_p10)
}
  0x1a   :  { %s1549_s28 = scalar_lea.vmem %s1711_s24, 2048  ;;  %p1554_p12 = scmp.lt.s32.totalorder %s1711_s24, %s1711_s24 }
  0x1b   :  { %p1550_p11 = scmp.ne.s32.totalorder %s1711_s24, %s1549_s28  ;;  %p1555_p13 = scmp.lt.s32.totalorder %s1549_s28, %s1549_s28 }
  0x1d   :  { %p1556_p0 = por %p1555_p13, %p1554_p12 }
  0x1f   :  { %p1557_p1 = pnand %p1556_p0, %p1550_p11 }
  0x21   :  { %1560 = shalt.err (!%p1557_p1)
}
  0x22   :  { %74 = dma.hbm_to_vmem [thread:$0]  %s1971_s6, 2048, %s1711_s24, [#allocation8], %s1635_s15, %s1635_s15, %s1636_s16  }
  0x23   :  { %s1637_s29 = smov [#allocation2]   ;;  %s1638_s13 = smov [#allocation6]  }
  0x24   :  { %s30_s30 = sshll.u32 %s1637_s29, 4  ;;  %s56_s14 = sshll.u32 %s1638_s13, 4  ;;  %s31_s30 = int_to_ptr.vmem [resolvable:$true] %s30_s30  ;;  %s1748_s14 = int_to_ptr.vmem [resolvable:$true] %s56_s14 }
  0x25   :  { %s1561_s19 = scalar_lea.hbm %s1967_s2, 8192 }
  0x26   :  { %p1562_p2 = scmp.ne.s32.totalorder %s1967_s2, %s1561_s19  ;;  %p1565_p3 = scmp.lt.u32.totalorder %s1561_s19, %s1967_s2 }
  0x28   :  { %p1567_p4 = pnand %p1565_p3, %p1562_p2 }
  0x2a   :  { %1570 = shalt.err (!%p1567_p4)
}
  0x2b   :  { %s1571_s6 = scalar_lea.vmem %s31_s30, 8192  ;;  %p1576_p6 = scmp.lt.s32.totalorder %s31_s30, %s31_s30 }
  0x2c   :  { %p1572_p5 = scmp.ne.s32.totalorder %s31_s30, %s1571_s6  ;;  %p1577_p7 = scmp.lt.s32.totalorder %s1571_s6, %s1571_s6 }
  0x2e   :  { %p1578_p8 = por %p1577_p7, %p1576_p6 }
  0x30   :  { %p1579_p9 = pnand %p1578_p8, %p1572_p5 }
  0x32   :  { %1582 = shalt.err (!%p1579_p9)
}
  0x33   :  { %36 = dma.hbm_to_vmem [thread:$0]  %s1967_s2, 8192, %s31_s30, [#allocation3], %s1635_s15, %s1635_s15, %s1636_s16  }
  0x34   :  { %s1583_s3 = scalar_lea.hbm %s1970_s5, 2048 }
  0x35   :  { %p1584_p10 = scmp.ne.s32.totalorder %s1970_s5, %s1583_s3  ;;  %p1587_p11 = scmp.lt.u32.totalorder %s1583_s3, %s1970_s5 }
  0x37   :  { %p1589_p12 = pnand %p1587_p11, %p1584_p10 }
  0x39   :  { %1592 = shalt.err (!%p1589_p12)
}
  0x3a   :  { %s1593_s18 = scalar_lea.vmem %s1748_s14, 2048  ;;  %p1598_p0 = scmp.lt.s32.totalorder %s1748_s14, %s1748_s14 }
  0x3b   :  { %p1594_p13 = scmp.ne.s32.totalorder %s1748_s14, %s1593_s18  ;;  %p1599_p1 = scmp.lt.s32.totalorder %s1593_s18, %s1593_s18 }
  0x3d   :  { %p1600_p2 = por %p1599_p1, %p1598_p0 }
  0x3f   :  { %p1601_p3 = pnand %p1600_p2, %p1594_p13 }
  0x41   :  { %1604 = shalt.err (!%p1601_p3)
}
  0x42   :  { %62 = dma.hbm_to_vmem [thread:$0]  %s1970_s5, 2048, %s1748_s14, [#allocation5], %s1635_s15, %s1635_s15, %s1636_s16  }
  0x43   :  { %s1639_s19 = smov [#allocation9]   ;;  %s1605_s25 = scalar_lea.hbm %s1974_s9, 4096 }
  0x44   :  { %s84_s20 = sshll.u32 %s1639_s19, 4  ;;  %p1606_p4 = scmp.ne.s32.totalorder %s1974_s9, %s1605_s25  ;;  %s85_s20 = int_to_ptr.vmem [resolvable:$true] %s84_s20 }
  0x45   :  { %p1609_p5 = scmp.lt.u32.totalorder %s1605_s25, %s1974_s9 }
  0x47   :  { %p1611_p6 = pnand %p1609_p5, %p1606_p4 }
  0x49   :  { %1614 = shalt.err (!%p1611_p6)
}
  0x4a   :  { %s1615_s28 = scalar_lea.vmem %s85_s20, 4096  ;;  %p1620_p8 = scmp.lt.s32.totalorder %s85_s20, %s85_s20 }
  0x4b   :  { %p1616_p7 = scmp.ne.s32.totalorder %s85_s20, %s1615_s28  ;;  %p1621_p9 = scmp.lt.s32.totalorder %s1615_s28, %s1615_s28 }
  0x4d   :  { %p1622_p10 = por %p1621_p9, %p1620_p8 }
  0x4f   :  { %p1623_p11 = pnand %p1622_p10, %p1616_p7 }
  0x51   :  { %1626 = shalt.err (!%p1623_p11)
}
  0x52   :  { %s1640_s5 = smov 256   ;;  %s1641_s15 = smov 16  }
  0x53   :  { %90 = dma.hbm_to_vmem [thread:$0]  %s1974_s9, 4096, %s85_s20, [#allocation8], %s1640_s5, %s1640_s5, %s1641_s15  }
  0x54   :  { %1627 = dma.done.wait [#allocation3], 8192  }
  0x55   :  { %1628 = vsyncadd [#allocation3], 4294959104 }
  0x56   :  { %1629 = dma.done.wait [#allocation5], 2560  }
  0x57   :  { %1630 = vsyncadd [#allocation5], 4294964736 }
  0x58   :  { %1631 = dma.done.wait [#allocation8], 6144  }
  0x59   :  { %1632 = vsyncadd [#allocation8], 4294961152  ;;  %v157_v0 = vld [vmem:[#allocation2 + $0x180] sm:$0xff]  ;;  %v158_v1 = vld [vmem:[#allocation2 + $0x188] sm:$0xff]  ;;  %vm347_vm0 = vcmask 23552   ;;  %vm360_vm1 = vcmask 1042432  }
  0x5a   :  { %v123_v2 = vld [vmem:[#allocation2 + $0x80] sm:$0xff]  ;;  %v1356_v3 = vpack.c.bf16 %v158_v1, %v157_v0  ;;  %v124_v4 = vld [vmem:[#allocation2 + $0x88] sm:$0xff]  ;;  %v159_v11 = vld [vmem:[#allocation2 + $0x190] sm:$0xff]  ;;  %vm1644_vm2 = vmmov 0   ;;  %vm666_vm3 = vcmask 261120   ;;  %vm860_vm4 = vcmask 15360  }
  0x5b   :  { %v141_v5 = vld [vmem:[#allocation2 + $0x100] sm:$0xff]  ;;  %v142_v6 = vld [vmem:[#allocation2 + $0x108] sm:$0xff]  ;;  %v1388_v7 = vpack.c.bf16 %v124_v4, %v123_v2  ;;  %v160_v13 = vld [vmem:[#allocation2 + $0x198] sm:$0xff]  ;;  %vm1057_vm5 = vcmask 1041408  }
  0x5c   :  { %v1358_v8 = vpack.c.bf16 %v142_v6, %v141_v5  ;;  %v107_v9 = vld [vmem:[#allocation2] sm:$0xff]  ;;  %v108_v10 = vld [vmem:[#allocation2 + $0x8] sm:$0xff]  ;;  %1357 = vmatprep.subr.bf16.mxu0 %v1356_v3  ;;  %v125_v14 = vld [vmem:[#allocation2 + $0x90] sm:$0xff]  ;;  %v1360_v16 = vpack.c.bf16 %v160_v13, %v159_v11 }
  0x5d   :  { %v1390_v12 = vpack.c.bf16 %v108_v10, %v107_v9  ;;  %v126_v15 = vld [vmem:[#allocation2 + $0x98] sm:$0xff]  ;;  %1389 = vmatprep.subr.bf16.mxu1 %v1388_v7  ;;  %v143_v18 = vld [vmem:[#allocation2 + $0x110] sm:$0xff]  ;;  %v161_v23 = vld [vmem:[#allocation2 + $0x1a0] sm:$0xff] }
  0x5e   :  { %1359 = vmatpush3.bf16.msra.mxu0 %v1358_v8  ;;  %v1392_v17 = vpack.c.bf16 %v126_v15, %v125_v14  ;;  %v144_v19 = vld [vmem:[#allocation2 + $0x118] sm:$0xff]  ;;  %v109_v20 = vld [vmem:[#allocation2 + $0x10] sm:$0xff]  ;;  %v162_v24 = vld [vmem:[#allocation2 + $0x1a8] sm:$0xff] }
  0x5f   :  { %1391 = vmatpush3.bf16.msra.mxu1 %v1390_v12  ;;  %v1362_v21 = vpack.c.bf16 %v144_v19, %v143_v18  ;;  %v110_v22 = vld [vmem:[#allocation2 + $0x18] sm:$0xff]  ;;  %1361 = vmatprep.subr.bf16.mxu0 %v1360_v16  ;;  %v1364_v26 = vpack.c.bf16 %v162_v24, %v161_v23  ;;  %v127_v27 = vld [vmem:[#allocation2 + $0xa0] sm:$0xff]  ;;  %v128_v28 = vld [vmem:[#allocation2 + $0xa8] sm:$0xff] }
  0x60   :  { %1393 = vmatprep.subr.bf16.mxu1 %v1392_v17  ;;  %v1394_v25 = vpack.c.bf16 %v110_v22, %v109_v20  ;;  %v145_v29 = vld [vmem:[#allocation2 + $0x120] sm:$0xff]  ;;  %v1396_v30 = vpack.c.bf16 %v128_v28, %v127_v27  ;;  %v146_v31 = vld [vmem:[#allocation2 + $0x128] sm:$0xff]  ;;  %v163_v35 = vld [vmem:[#allocation2 + $0x1b0] sm:$0xff] }
  0x61   :  { %v111_v32 = vld [vmem:[#allocation2 + $0x20] sm:$0xff]  ;;  %v112_v33 = vld [vmem:[#allocation2 + $0x28] sm:$0xff]  ;;  %v1366_v34 = vpack.c.bf16 %v146_v31, %v145_v29  ;;  %v164_v36 = vld [vmem:[#allocation2 + $0x1b8] sm:$0xff] }
  0x62   :  { %1363 = vmatpush3.bf16.msra.mxu0 %v1362_v21  ;;  %v129_v37 = vld [vmem:[#allocation2 + $0xb0] sm:$0xff]  ;;  %v1398_v38 = vpack.c.bf16 %v112_v33, %v111_v32  ;;  %v1368_v39 = vpack.c.bf16 %v164_v36, %v163_v35  ;;  %v130_v40 = vld [vmem:[#allocation2 + $0xb8] sm:$0xff]  ;;  %v165_v46 = vld [vmem:[#allocation2 + $0x1c0] sm:$0xff] }
  0x63   :  { %1395 = vmatpush3.bf16.msra.mxu1 %v1394_v25  ;;  %1365 = vmatprep.subr.bf16.mxu0 %v1364_v26  ;;  %v147_v41 = vld [vmem:[#allocation2 + $0x130] sm:$0xff]  ;;  %v148_v42 = vld [vmem:[#allocation2 + $0x138] sm:$0xff]  ;;  %v1400_v43 = vpack.c.bf16 %v130_v40, %v129_v37  ;;  %v166_v47 = vld [vmem:[#allocation2 + $0x1c8] sm:$0xff] }
  0x64   :  { %1397 = vmatprep.subr.bf16.mxu1 %v1396_v30  ;;  %v113_v44 = vld [vmem:[#allocation2 + $0x30] sm:$0xff]  ;;  %v114_v45 = vld [vmem:[#allocation2 + $0x38] sm:$0xff]  ;;  %v131_v48 = vld [vmem:[#allocation2 + $0xc0] sm:$0xff]  ;;  %v1370_v50 = vpack.c.bf16 %v148_v42, %v147_v41  ;;  %v1372_v52 = vpack.c.bf16 %v166_v47, %v165_v46 }
  0x65   :  { %v132_v49 = vld [vmem:[#allocation2 + $0xc8] sm:$0xff]  ;;  %v1402_v51 = vpack.c.bf16 %v114_v45, %v113_v44  ;;  %v149_v53 = vld [vmem:[#allocation2 + $0x140] sm:$0xff]  ;;  %v167_v58 = vld [vmem:[#allocation2 + $0x1d0] sm:$0xff] }
  0x66   :  { %1367 = vmatpush3.bf16.msra.mxu0 %v1366_v34  ;;  %v150_v54 = vld [vmem:[#allocation2 + $0x148] sm:$0xff]  ;;  %v115_v55 = vld [vmem:[#allocation2 + $0x40] sm:$0xff]  ;;  %v1404_v56 = vpack.c.bf16 %v132_v49, %v131_v48  ;;  %v168_v59 = vld [vmem:[#allocation2 + $0x1d8] sm:$0xff] }
  0x67   :  { %1399 = vmatpush3.bf16.msra.mxu1 %v1398_v38  ;;  %1369 = vmatprep.subr.bf16.mxu0 %v1368_v39  ;;  %v116_v57 = vld [vmem:[#allocation2 + $0x48] sm:$0xff]  ;;  %v133_v60 = vld [vmem:[#allocation2 + $0xd0] sm:$0xff]  ;;  %v134_v61 = vld [vmem:[#allocation2 + $0xd8] sm:$0xff]  ;;  %v1374_v62 = vpack.c.bf16 %v150_v54, %v149_v53  ;;  %v1376_v0 = vpack.c.bf16 %v168_v59, %v167_v58  ;;  %v1642_v39 = vmov 0  }
  0x68   :  { %1401 = vmatprep.subr.bf16.mxu1 %v1400_v43  ;;  %v1406_v63 = vpack.c.bf16 %v116_v57, %v115_v55  ;;  %v151_v1 = vld [vmem:[#allocation2 + $0x150] sm:$0xff]  ;;  %v152_v2 = vld [vmem:[#allocation2 + $0x158] sm:$0xff]  ;;  %v1408_v4 = vpack.c.bf16 %v134_v61, %v133_v60  ;;  %v169_v6 = vld [vmem:[#allocation2 + $0x1e0] sm:$0xff]  ;;  %1511 = vset.pattern.permute.xlu0 %v1642_v39 }
  0x69   :  { %v117_v3 = vld [vmem:[#allocation2 + $0x50] sm:$0xff]  ;;  %v118_v5 = vld [vmem:[#allocation2 + $0x58] sm:$0xff]  ;;  %v170_v7 = vld [vmem:[#allocation2 + $0x1e8] sm:$0xff]  ;;  %v1378_v10 = vpack.c.bf16 %v152_v2, %v151_v1  ;;  %1512 = vset.pattern.permute.xlu1 %v1642_v39 }
  0x6a   :  { %1371 = vmatpush3.bf16.msra.mxu0 %v1370_v50  ;;  %v135_v8 = vld [vmem:[#allocation2 + $0xe0] sm:$0xff]  ;;  %v136_v9 = vld [vmem:[#allocation2 + $0xe8] sm:$0xff]  ;;  %v1410_v13 = vpack.c.bf16 %v118_v5, %v117_v3  ;;  %v1380_v14 = vpack.c.bf16 %v170_v7, %v169_v6  ;;  %v171_v20 = vld [vmem:[#allocation2 + $0x1f0] sm:$0xff] }
  0x6b   :  { %1403 = vmatpush3.bf16.msra.mxu1 %v1402_v51  ;;  %1373 = vmatprep.subr.bf16.mxu0 %v1372_v52  ;;  %v153_v11 = vld [vmem:[#allocation2 + $0x160] sm:$0xff]  ;;  %v154_v12 = vld [vmem:[#allocation2 + $0x168] sm:$0xff]  ;;  %v1412_v18 = vpack.c.bf16 %v136_v9, %v135_v8  ;;  %v172_v21 = vld [vmem:[#allocation2 + $0x1f8] sm:$0xff] }
  0x6c   :  { %1405 = vmatprep.subr.bf16.mxu1 %v1404_v56  ;;  %v119_v15 = vld [vmem:[#allocation2 + $0x60] sm:$0xff]  ;;  %v1122_v16 = vld [vmem:[%s1965_s0 + $0x8] sm:$0x77]  ;;  %v137_v24 = vld [vmem:[#allocation2 + $0xf0] sm:$0xff]  ;;  %v1382_v26 = vpack.c.bf16 %v154_v12, %v153_v11  ;;  %v1384_v28 = vpack.c.bf16 %v172_v21, %v171_v20 }
  0x6d   :  { %v106_v17 = vld [vmem:[%s1965_s0] sm:$0x77]  ;;  %v120_v19 = vld [vmem:[#allocation2 + $0x68] sm:$0xff]  ;;  %v174_v22 = vcombine.high %v1122_v16, %v1122_v16  ;;  %v138_v25 = vld [vmem:[#allocation2 + $0xf8] sm:$0xff] }
  0x6e   :  { %1375 = vmatpush3.bf16.msra.mxu0 %v1374_v62  ;;  %v247_v23 = vcombine.high %v106_v17, %v106_v17  ;;  %v1414_v27 = vpack.c.bf16 %v120_v19, %v119_v15  ;;  %v155_v29 = vld [vmem:[#allocation2 + $0x170] sm:$0xff]  ;;  %v156_v30 = vld [vmem:[#allocation2 + $0x178] sm:$0xff]  ;;  %v1416_v31 = vpack.c.bf16 %v138_v25, %v137_v24  ;;  %v319_v36 = vld [vmem:[#allocation4] sm:$0xff] }
  0x6f   :  { %1407 = vmatpush3.bf16.msra.mxu1 %v1406_v63  ;;  %1377 = vmatprep.subr.bf16.mxu0 %v1376_v0  ;;  %v121_v32 = vld [vmem:[#allocation2 + $0x70] sm:$0xff]  ;;  %v122_v33 = vld [vmem:[#allocation2 + $0x78] sm:$0xff]  ;;  %v1386_v34 = vpack.c.bf16 %v156_v30, %v155_v29  ;;  %v323_v37 = vld [vmem:[%s1969_s4] sm:$0xff] }
  0x70   :  { %1409 = vmatprep.subr.bf16.mxu1 %v1408_v4  ;;  %240 = vmatprep.mubr.f32.mxu0 %v174_v22  ;;  %v1418_v35 = vpack.c.bf16 %v122_v33, %v121_v32  ;;  %v325_v38 = vld [vmem:[%s1969_s4 + $0x10] sm:$0xff]  ;;  %v324_v40 = vld [vmem:[%s1969_s4 + $0x8] sm:$0xff]  ;;  %v326_v41 = vld [vmem:[%s1969_s4 + $0x18] sm:$0xff] }
  0x71   :  { %313 = vmatprep.mubr.f32.mxu1 %v247_v23  ;;  %329 = vperm.xlu0 %1511, %v323_v37   ;;  %v453_v42 = vld [vmem:[#allocation6] sm:$0xff]  ;;  %v454_v43 = vld [vmem:[#allocation6 + $0x8] sm:$0xff]  ;;  %v455_v47 = vld [vmem:[#allocation6 + $0x10] sm:$0xff] }
  0x72   :  { %1379 = vmatpush3.bf16.msra.mxu0 %v1378_v10  ;;  %339 = vperm.xlu1 %1512, %v325_v38   ;;  %v570_v44 = vld [vmem:[%s1972_s7] sm:$0xff]  ;;  %v571_v45 = vld [vmem:[%s1972_s7 + $0x8] sm:$0xff]  ;;  %v1420_v46 = vpack.c.bf16 %v454_v43, %v453_v42  ;;  %v456_v48 = vld [vmem:[#allocation6 + $0x18] sm:$0xff] }
  0x73   :  { %1411 = vmatpush3.bf16.msra.mxu1 %v1410_v13  ;;  %1381 = vmatprep.subr.bf16.mxu0 %v1380_v14  ;;  %v1424_v49 = vpack.c.bf16 %v456_v48, %v455_v47  ;;  %v572_v50 = vld [vmem:[%s1972_s7 + $0x10] sm:$0xff]  ;;  %v573_v51 = vld [vmem:[%s1972_s7 + $0x18] sm:$0xff]  ;;  %v457_v52 = vld [vmem:[#allocation6 + $0x20] sm:$0xff] }
  0x74   :  { %1413 = vmatprep.subr.bf16.mxu1 %v1412_v18  ;;  %v458_v53 = vld [vmem:[#allocation6 + $0x28] sm:$0xff]  ;;  %v574_v55 = vld [vmem:[%s1972_s7 + $0x20] sm:$0xff]  ;;  %v459_v57 = vld [vmem:[#allocation6 + $0x30] sm:$0xff] }
  0x75   :  { %334 = vperm.xlu0 %1511, %v324_v40   ;;  %v1428_v54 = vpack.c.bf16 %v458_v53, %v457_v52  ;;  %v575_v56 = vld [vmem:[%s1972_s7 + $0x28] sm:$0xff]  ;;  %v460_v58 = vld [vmem:[#allocation6 + $0x38] sm:$0xff]  ;;  %v576_v60 = vld [vmem:[%s1972_s7 + $0x30] sm:$0xff] }
  0x76   :  { %1383 = vmatpush3.bf16.msra.mxu0 %v1382_v26  ;;  %344 = vperm.xlu1 %1512, %v326_v41   ;;  %v1432_v59 = vpack.c.bf16 %v460_v58, %v459_v57  ;;  %v577_v61 = vld [vmem:[%s1972_s7 + $0x38] sm:$0xff]  ;;  %v461_v62 = vld [vmem:[#allocation6 + $0x40] sm:$0xff]  ;;  %v462_v63 = vld [vmem:[#allocation6 + $0x48] sm:$0xff]  ;;  %v1643_v26 = vmov 0.0|0.0  }
  0x77   :  { %1415 = vmatpush3.bf16.msra.mxu1 %v1414_v27  ;;  %1385 = vmatprep.subr.bf16.mxu0 %v1384_v28  ;;  %v1436_v0 = vpack.c.bf16 %v462_v63, %v461_v62  ;;  %v578_v1 = vld [vmem:[%s1972_s7 + $0x40] sm:$0xff]  ;;  %v579_v2 = vld [vmem:[%s1972_s7 + $0x48] sm:$0xff]  ;;  %v463_v3 = vld [vmem:[#allocation6 + $0x50] sm:$0xff] }
  0x78   :  { %1417 = vmatprep.subr.bf16.mxu1 %v1416_v31  ;;  %v464_v4 = vld [vmem:[#allocation6 + $0x58] sm:$0xff]  ;;  %v580_v6 = vld [vmem:[%s1972_s7 + $0x50] sm:$0xff]  ;;  %v465_v8 = vld [vmem:[#allocation6 + $0x60] sm:$0xff] }
  0x79   :  { %588 = vperm.xlu0 %1511, %v570_v44   ;;  %v1440_v5 = vpack.c.bf16 %v464_v4, %v463_v3  ;;  %v581_v7 = vld [vmem:[%s1972_s7 + $0x58] sm:$0xff]  ;;  %v466_v9 = vld [vmem:[#allocation6 + $0x68] sm:$0xff]  ;;  %v582_v11 = vld [vmem:[%s1972_s7 + $0x60] sm:$0xff] }
  0x7a   :  { %1387 = vmatpush3.bf16.msra.mxu0 %v1386_v34  ;;  %593 = vperm.xlu1 %1512, %v571_v45   ;;  %v1444_v10 = vpack.c.bf16 %v466_v9, %v465_v8  ;;  %v583_v12 = vld [vmem:[%s1972_s7 + $0x68] sm:$0xff]  ;;  %v321_v21 = vld [vmem:[#allocation4 + $0x10] sm:$0xff]  ;;  %v322_v22 = vld [vmem:[#allocation4 + $0x18] sm:$0xff]  ;;  %v1645_v45 = vmov 0.0  }
  0x7b   :  { %1419 = vmatpush3.bf16.msra.mxu1 %v1418_v35  ;;  %v320_v20 = vld [vmem:[#allocation4 + $0x8] sm:$0xff]  ;;  %v467_v23 = vld [vmem:[#allocation6 + $0x70] sm:$0xff]  ;;  %v468_v24 = vld [vmem:[#allocation6 + $0x78] sm:$0xff] }
  0x7c   :  { %1421 = vmatprep.subr.bf16.mxu1 %v1420_v46  ;;  %v1448_v25 = vpack.c.bf16 %v468_v24, %v467_v23  ;;  %v554_v47 = vld [vmem:[#allocation7] sm:$0xff]  ;;  %v957_v52 = vld [vmem:[#allocation9 + $0x18] sm:$0xff]  ;;  %v956_v58 = vld [vmem:[#allocation9 + $0x10] sm:$0xff] }
  0x7d   :  { %241 = vmatmul.mubr.f32.vlgmr.msra.gmra.mrb[0].mxu0 %v1122_v16  ;;  %598 = vperm.xlu0 %1511, %v572_v50   ;;  %v954_v57 = vld [vmem:[#allocation9] sm:$0xff]  ;;  %v555_v62 = vld [vmem:[#allocation7 + $0x8] sm:$0xff]  ;;  %v960_v4 = vld [vmem:[#allocation9 + $0x30] sm:$0xff] }
  0x7e   :  { %314 = vmatmul.mubr.f32.vlgmr.msra.gmra.mrb[0].mxu1 %v106_v17  ;;  %1269 = vmatprep.mubr.msk.f32.mxu0 %vm347_vm0, %v319_v36  ;;  %v1468_v63 = vpack.c.bf16 %v956_v58, %v954_v57  ;;  %v958_v3 = vld [vmem:[#allocation9 + $0x20] sm:$0xff]  ;;  %v561_v23 = vld [vmem:[#allocation7 + $0x38] sm:$0xff] }
  0x7f   :  { %1423 = vmatpush3.bf16.msra.mxu1 %v1420_v46  ;;  %603 = vperm.xlu1 %1512, %v573_v51   ;;  %v877_v46 = vld [vmem:[%s1966_s1] sm:$0x3]  ;;  %v955_v51 = vld [vmem:[#allocation9 + $0x8] sm:$0xff]  ;;  %v1472_v8 = vpack.c.bf16 %v960_v4, %v958_v3 }
  0x80   :  { %1425 = vmatprep.subr.bf16.mxu1 %v1424_v49  ;;  %v558_v9 = vld [vmem:[#allocation7 + $0x20] sm:$0xff] }
  0x81   :  { %608 = vperm.xlu0 %1511, %v574_v55  }
  0x83   :  { %1427 = vmatpush3.bf16.msra.mxu1 %v1424_v49  ;;  %613 = vperm.xlu1 %1512, %v575_v56   ;;  %v1466_v56 = vpack.c.bf16 %v957_v52, %v955_v51  ;;  %v982_v52 = vld [vmem:[#allocation9 + $0xe0] sm:$0xff] }
  0x84   :  { %1429 = vmatprep.subr.bf16.mxu1 %v1428_v54 }
  0x85   :  { %618 = vperm.xlu0 %1511, %v576_v60   ;;  %v961_v60 = vld [vmem:[#allocation9 + $0x38] sm:$0xff] }
  0x87   :  { %1431 = vmatpush3.bf16.msra.mxu1 %v1428_v54  ;;  %623 = vperm.xlu1 %1512, %v577_v61  }
  0x88   :  { %1433 = vmatprep.subr.bf16.mxu1 %v1432_v59 }
  0x89   :  { %628 = vperm.xlu0 %1511, %v578_v1   ;;  %v556_v1 = vld [vmem:[#allocation7 + $0x10] sm:$0xff] }
  0x8b   :  { %1435 = vmatpush3.bf16.msra.mxu1 %v1432_v59  ;;  %633 = vperm.xlu1 %1512, %v579_v2   ;;  %v959_v59 = vld [vmem:[#allocation9 + $0x28] sm:$0xff] }
  0x8c   :  { %1437 = vmatprep.subr.bf16.mxu1 %v1436_v0  ;;  %v1470_v2 = vpack.c.bf16 %v961_v60, %v959_v59 }
  0x8d   :  { %638 = vperm.xlu0 %1511, %v580_v6   ;;  %v965_v6 = vld [vmem:[#allocation9 + $0x58] sm:$0xff] }
  0x8f   :  { %1439 = vmatpush3.bf16.msra.mxu1 %v1436_v0  ;;  %643 = vperm.xlu1 %1512, %v581_v7   ;;  %v557_v7 = vld [vmem:[#allocation7 + $0x18] sm:$0xff] }
  0x90   :  { %1441 = vmatprep.subr.bf16.mxu1 %v1440_v5 }
  0x91   :  { %648 = vperm.xlu0 %1511, %v582_v11   ;;  %v962_v11 = vld [vmem:[#allocation9 + $0x40] sm:$0xff] }
  0x93   :  { %1443 = vmatpush3.bf16.msra.mxu1 %v1440_v5  ;;  %653 = vperm.xlu1 %1512, %v583_v12   ;;  %v963_v5 = vld [vmem:[#allocation9 + $0x48] sm:$0xff]  ;;  %v964_v12 = vld [vmem:[#allocation9 + $0x50] sm:$0xff] }
  0x94   :  { %1445 = vmatprep.subr.bf16.mxu1 %v1444_v10 }
  0x97   :  { %1447 = vmatpush3.bf16.msra.mxu1 %v1444_v10  ;;  %v1474_v10 = vpack.c.bf16 %v965_v6, %v963_v5 }
  0x98   :  { %1449 = vmatprep.subr.bf16.mxu1 %v1448_v25 }
  0x9b   :  { %1451 = vmatpush3.bf16.msra.mxu1 %v1448_v25  ;;  %v562_v25 = vld [vmem:[#allocation7 + $0x40] sm:$0xff] }
  0x9c   :  { %1460 = vmatprep.subr.bf16.mxu1 %v1643_v26 }
  0xf0   :  { %v330_v27 = vpop.permute.xlu0 %329 }
  0xf1   :  { %v340_v28 = vpop.permute.xlu1 %339 }
  0xf4   :  { %v335_v29 = vpop.permute.xlu0 %334 }
  0xf5   :  { %v345_v35 = vpop.permute.xlu1 %344 }
  0xf8   :  { %v589_v60 = vpop.permute.xlu0 %588 }
  0xf9   :  { %v594_v59 = vpop.permute.xlu1 %593 }
 0x150   :  { %v1179_v13 = vpop.f32.mrb[0].mxu0 }
 0x151   :  { %v1214_v14 = vpop.f32.mrb[0].mxu1  ;;  %v1180_v15 = vpop.f32.mrb[1].mxu0 }
 0x152   :  { %v1181_v16 = vadd.f32 %v1180_v15, %v1179_v13  ;;  %v1215_v17 = vpop.f32.mrb[1].mxu1  ;;  %v967_v13 = vld [vmem:[#allocation9 + $0x68] sm:$0xff] }
 0x153   :  { %v1216_v18 = vadd.f32 %v1215_v17, %v1214_v14  ;;  %v969_v14 = vld [vmem:[#allocation9 + $0x78] sm:$0xff]  ;;  %v559_v15 = vld [vmem:[#allocation7 + $0x28] sm:$0xff]  ;;  %v560_v17 = vld [vmem:[#allocation7 + $0x30] sm:$0xff] }
 0x155   :  { %v316_v19 = vadd.f32 %v1216_v18, %v1181_v16  ;;  %v1476_v16 = vpack.c.bf16 %v964_v12, %v962_v11  ;;  %v1478_v18 = vpack.c.bf16 %v969_v14, %v967_v13 }
 0x157   :  { %1267 = vmatprep.subr.msk.mxu0 %vm360_vm1, %v316_v19 }
 0x158   :  { %1268 = vmatpush3.msk.msra.mxu0 %vm360_vm1, %v316_v19  ;;  %v966_v19 = vld [vmem:[#allocation9 + $0x60] sm:$0xff] }
 0x159   :  { %1270 = vmatmul.mubr.msk.f32.vlgmr.msra.gmra.mrb[2].mxu0 %vm347_vm0, %v320_v20  ;;  %v968_v20 = vld [vmem:[#allocation9 + $0x70] sm:$0xff] }
 0x15a   :  { %1272 = vmatprep.mubr.msk.f32.mxu0 %vm347_vm0, %v321_v21  ;;  %v971_v21 = vld [vmem:[#allocation9 + $0x88] sm:$0xff]  ;;  %v1480_v24 = vpack.c.bf16 %v968_v20, %v966_v19 }
 0x15d   :  { %1273 = vmatmul.mubr.msk.f32.gmra.mrb[4].mxu0 %vm347_vm0, %v322_v22  ;;  %v973_v22 = vld [vmem:[#allocation9 + $0x98] sm:$0xff] }
 0x15e   :  { %1321 = vmatprep.mubr.msk.f32.mxu0 %vm666_vm3, %v554_v47  ;;  %v985_v47 = vld [vmem:[#allocation9 + $0xf8] sm:$0xff] }
 0x22c   :  { %v1271_v30 = vpop.f32.mrb[2].mxu0 }
 0x22d   :  { %v436_v31 = vadd.f32 %v1271_v30, %v335_v29  ;;  %v430_v32 = vpop.f32.mrb[3].mxu0  ;;  %v975_v29 = vld [vmem:[#allocation9 + $0xa8] sm:$0xff]  ;;  %v977_v30 = vld [vmem:[#allocation9 + $0xb8] sm:$0xff] }
 0x22e   :  { %v431_v33 = vadd.f32 %v430_v32, %v330_v27  ;;  %v970_v27 = vld [vmem:[#allocation9 + $0x80] sm:$0xff] }
 0x22f   :  { %v450_v34 = vmax.f32 %v436_v31, 0.0  ;;  %v563_v31 = vld [vmem:[#allocation7 + $0x48] sm:$0xff] }
 0x230   :  { %v449_v36 = vmax.f32 %v431_v33, 0.0  ;;  %v1274_v37 = vpop.f32.mrb[4].mxu0  ;;  %v564_v33 = vld [vmem:[#allocation7 + $0x50] sm:$0xff] }
 0x231   :  { %v446_v38 = vadd.f32 %v1274_v37, %v345_v35  ;;  %v440_v39 = vpop.f32.mrb[5].mxu0  ;;  %v974_v35 = vld [vmem:[#allocation9 + $0xa0] sm:$0xff]  ;;  %v979_v37 = vld [vmem:[#allocation9 + $0xc8] sm:$0xff] }
 0x232   :  { %v1461_v40 = vpack.c.bf16 %v450_v34, %v449_v36  ;;  %v441_v41 = vadd.f32 %v440_v39, %v340_v28  ;;  %1307 = vmatprep.mubr.f32.mxu1 %v449_v36  ;;  %v972_v28 = vld [vmem:[#allocation9 + $0x90] sm:$0xff]  ;;  %v565_v39 = vld [vmem:[#allocation7 + $0x58] sm:$0xff] }
 0x233   :  { %v452_v42 = vmax.f32 %v446_v38, 0.0  ;;  %1308 = vmatmul.mubr.f32.vlgmr.msra.gmra.mrb[2].mxu1 %v450_v34  ;;  %v1484_v32 = vpack.c.bf16 %v972_v28, %v970_v27  ;;  %v1486_v34 = vpack.c.bf16 %v977_v30, %v975_v29  ;;  %v976_v36 = vld [vmem:[#allocation9 + $0xb0] sm:$0xff]  ;;  %v981_v38 = vld [vmem:[#allocation9 + $0xd8] sm:$0xff] }
 0x234   :  { %v451_v43 = vmax.f32 %v441_v41, 0.0  ;;  %1462 = vmatpush3.bf16.msra.mxu1 %v1461_v40  ;;  %v1488_v40 = vpack.c.bf16 %v976_v36, %v974_v35  ;;  %v566_v41 = vld [vmem:[#allocation7 + $0x60] sm:$0xff] }
 0x235   :  { %1463 = vmatprep.subr.bf16.mxu1 %v1643_v26  ;;  %v1482_v26 = vpack.c.bf16 %v973_v22, %v971_v21 }
 0x236   :  { %v1464_v44 = vpack.c.bf16 %v452_v42, %v451_v43  ;;  %1310 = vmatprep.mubr.f32.mxu1 %v451_v43  ;;  %v978_v43 = vld [vmem:[#allocation9 + $0xc0] sm:$0xff] }
 0x237   :  { %1311 = vmatmul.mubr.f32.gmra.mrb[4].mxu1 %v452_v42  ;;  %v1490_v42 = vpack.c.bf16 %v981_v38, %v979_v37 }
 0x238   :  { %1465 = vmatpush3.bf16.msra.mxu1 %v1464_v44  ;;  %1353 = vmatprep.mubr.msk.f32.mxu1 %vm1644_vm2, %v1645_v45  ;;  %v980_v44 = vld [vmem:[#allocation9 + $0xd0] sm:$0xff] }
 0x23b   :  { %1354 = vmatmul.mubr.msk.f32.vlgmr.msra.gmra.mrb[6].mxu1 %vm666_vm3, %v877_v46  ;;  %v983_v46 = vld [vmem:[#allocation9 + $0xe8] sm:$0xff] }
 0x23c   :  { %v1494_v51 = vpack.c.bf16 %v985_v47, %v983_v46  ;;  %v585_v47 = vld [vmem:[%s1972_s7 + $0x78] sm:$0xff] }
 0x306   :  { %v1309_v48 = vpop.f32.mrb[2].mxu1 }
 0x307   :  { %v535_v49 = vpop.f32.mrb[3].mxu1 }
 0x308   :  { %v1452_v50 = vpack.c.bf16 %v1309_v48, %v535_v49  ;;  %v567_v48 = vld [vmem:[#allocation7 + $0x68] sm:$0xff]  ;;  %v1492_v49 = vpack.c.bf16 %v980_v44, %v978_v43 }
 0x30a   :  { %v1312_v53 = vpop.f32.mrb[4].mxu1  ;;  %1453 = vmatprep.subr.bf16.mxu0 %v1452_v50 }
 0x30b   :  { %v545_v54 = vpop.f32.mrb[5].mxu1  ;;  %1455 = vmatpush3.bf16.msra.mxu0 %v1452_v50  ;;  %v568_v50 = vld [vmem:[#allocation7 + $0x70] sm:$0xff] }
 0x30c   :  { %v1456_v55 = vpack.c.bf16 %v1312_v53, %v545_v54  ;;  %v984_v53 = vld [vmem:[#allocation9 + $0xf0] sm:$0xff] }
 0x30d   :  { %v1496_v57 = vpack.c.bf16 %v984_v53, %v982_v52 }
 0x30e   :  { %1457 = vmatprep.subr.bf16.mxu0 %v1456_v55  ;;  %v1867_v61 = vpop.f32.mrb[6].mxu1 }
 0x30f   :  { %1459 = vmatpush3.bf16.msra.mxu0 %v1456_v55  ;;  %v1355_v0 = vpop.f32.mrb[7].mxu1  ;;  %v951_v54 = vmax.f32 %v1867_v61, 0.0  ;;  %v952_v55 = vld [vmem:[%s1973_s8] sm:$0x3]  ;;  %v604_v61 = vpop.permute.xlu1 %603 }
 0x310   :  { %1467 = vmatprep.subr.bf16.mxu0 %v1466_v56  ;;  %v569_v56 = vld [vmem:[#allocation7 + $0x78] sm:$0xff] }
 0x311   :  { %v953_v58 = vmul.f32 %v952_v55, %v951_v54 }
 0x312   :  { %1322 = vmatmul.mubr.msk.f32.vlgmr.msra.gmra.mrb[6].mxu0 %vm666_vm3, %v555_v62  ;;  %v599_v62 = vpop.permute.xlu0 %598 }
 0x313   :  { %1469 = vmatpush1.bf16.msra.mxu0 %v1468_v63  ;;  %1324 = vmatprep.mubr.msk.f32.mxu0 %vm666_vm3, %v556_v1  ;;  %v614_v63 = vpop.permute.xlu1 %613 }
 0x314   :  { %1471 = vmatprep.subr.bf16.mxu0 %v1470_v2 }
 0x316   :  { %1325 = vmatmul.mubr.msk.f32.gmra.mrb[8].mxu0 %vm666_vm3, %v557_v7  ;;  %v609_v1 = vpop.permute.xlu0 %608 }
 0x317   :  { %1473 = vmatpush1.bf16.msra.mxu0 %v1472_v8  ;;  %1327 = vmatprep.mubr.msk.f32.mxu0 %vm666_vm3, %v558_v9  ;;  %v624_v7 = vpop.permute.xlu1 %623 }
 0x318   :  { %1475 = vmatprep.subr.bf16.mxu0 %v1474_v10 }
 0x31a   :  { %1328 = vmatmul.mubr.msk.f32.gmra.mrb[10].mxu0 %vm666_vm3, %v559_v15  ;;  %v619_v9 = vpop.permute.xlu0 %618 }
 0x31b   :  { %1477 = vmatpush1.bf16.msra.mxu0 %v1476_v16  ;;  %1330 = vmatprep.mubr.msk.f32.mxu0 %vm666_vm3, %v560_v17  ;;  %v634_v14 = vpop.permute.xlu1 %633 }
 0x31c   :  { %1479 = vmatprep.subr.bf16.mxu0 %v1478_v18 }
 0x31e   :  { %1331 = vmatmul.mubr.msk.f32.gmra.mrb[12].mxu0 %vm666_vm3, %v561_v23  ;;  %v629_v16 = vpop.permute.xlu0 %628 }
 0x31f   :  { %1481 = vmatpush1.bf16.msra.mxu0 %v1480_v24  ;;  %1333 = vmatprep.mubr.msk.f32.mxu0 %vm666_vm3, %v562_v25  ;;  %v644_v23 = vpop.permute.xlu1 %643 }
 0x320   :  { %1483 = vmatprep.subr.bf16.mxu0 %v1482_v26 }
 0x322   :  { %1334 = vmatmul.mubr.msk.f32.gmra.mrb[14].mxu0 %vm666_vm3, %v563_v31  ;;  %v639_v25 = vpop.permute.xlu0 %638 }
 0x323   :  { %1485 = vmatpush1.bf16.msra.mxu0 %v1484_v32  ;;  %1336 = vmatprep.mubr.msk.f32.mxu0 %vm666_vm3, %v564_v33  ;;  %v654_v30 = vpop.permute.xlu1 %653 }
 0x324   :  { %1487 = vmatprep.subr.bf16.mxu0 %v1486_v34 }
 0x326   :  { %1337 = vmatmul.mubr.msk.f32.gmra.mrb[16].mxu0 %vm666_vm3, %v565_v39  ;;  %v649_v32 = vpop.permute.xlu0 %648 }
 0x327   :  { %1489 = vmatpush1.bf16.msra.mxu0 %v1488_v40  ;;  %1339 = vmatprep.mubr.msk.f32.mxu0 %vm666_vm3, %v566_v41 }
 0x328   :  { %1491 = vmatprep.subr.bf16.mxu0 %v1490_v42 }
 0x32a   :  { %1340 = vmatmul.mubr.msk.f32.gmra.mrb[18].mxu0 %vm666_vm3, %v567_v48  ;;  %v584_v48 = vld [vmem:[%s1972_s7 + $0x70] sm:$0xff] }
 0x32b   :  { %1493 = vmatpush1.bf16.msra.mxu0 %v1492_v49  ;;  %1342 = vmatprep.mubr.msk.f32.mxu0 %vm666_vm3, %v568_v50 }
 0x32c   :  { %1495 = vmatprep.subr.bf16.mxu0 %v1494_v51 }
 0x32e   :  { %1343 = vmatmul.mubr.msk.f32.gmra.mrb[20].mxu0 %vm666_vm3, %v569_v56 }
 0x32f   :  { %1497 = vmatpush1.bf16.msra.mxu0 %v1496_v57  ;;  %1050 = vmatprep.mubr.f32.mxu0 %v1645_v45 }
 0x332   :  { %1051 = vmatmul.mubr.f32.vlgmr.msra.gmra.mrb[22].mxu0 %v953_v58 }
 0x3e5   :  { %v1323_v0 = vpop.f32.mrb[6].mxu0 }
 0x3e6   :  { %v787_v2 = vadd.f32 %v1323_v0, %v594_v59  ;;  %v781_v3 = vpop.f32.mrb[7].mxu0 }
 0x3e7   :  { %v782_v4 = vadd.f32 %v781_v3, %v589_v60 }
 0x3e8   :  { %862 = vst.msk [vmem:[%s1975_s10 + $0x8] sm:$0xff] %vm860_vm4, %v787_v2 }
 0x3e9   :  { %861 = vst.msk [vmem:[%s1975_s10] sm:$0xff] %vm860_vm4, %v782_v4  ;;  %v1326_v45 = vpop.f32.mrb[8].mxu0 }
 0x3ea   :  { %v797_v5 = vadd.f32 %v1326_v45, %v604_v61  ;;  %v791_v6 = vpop.f32.mrb[9].mxu0 }
 0x3eb   :  { %v792_v8 = vadd.f32 %v791_v6, %v599_v62 }
 0x3ec   :  { %864 = vst.msk [vmem:[%s1975_s10 + $0x18] sm:$0xff] %vm860_vm4, %v797_v5 }
 0x3ed   :  { %863 = vst.msk [vmem:[%s1975_s10 + $0x10] sm:$0xff] %vm860_vm4, %v792_v8  ;;  %v1329_v10 = vpop.f32.mrb[10].mxu0 }
 0x3ee   :  { %v807_v11 = vadd.f32 %v1329_v10, %v614_v63  ;;  %v801_v12 = vpop.f32.mrb[11].mxu0 }
 0x3ef   :  { %v802_v13 = vadd.f32 %v801_v12, %v609_v1 }
 0x3f0   :  { %866 = vst.msk [vmem:[%s1975_s10 + $0x28] sm:$0xff] %vm860_vm4, %v807_v11 }
 0x3f1   :  { %865 = vst.msk [vmem:[%s1975_s10 + $0x20] sm:$0xff] %vm860_vm4, %v802_v13  ;;  %v1332_v15 = vpop.f32.mrb[12].mxu0 }
 0x3f2   :  { %v817_v17 = vadd.f32 %v1332_v15, %v624_v7  ;;  %v811_v18 = vpop.f32.mrb[13].mxu0 }
 0x3f3   :  { %v812_v19 = vadd.f32 %v811_v18, %v619_v9 }
 0x3f4   :  { %868 = vst.msk [vmem:[%s1975_s10 + $0x38] sm:$0xff] %vm860_vm4, %v817_v17 }
 0x3f5   :  { %867 = vst.msk [vmem:[%s1975_s10 + $0x30] sm:$0xff] %vm860_vm4, %v812_v19  ;;  %v1335_v20 = vpop.f32.mrb[14].mxu0 }
 0x3f6   :  { %v827_v21 = vadd.f32 %v1335_v20, %v634_v14  ;;  %v821_v22 = vpop.f32.mrb[15].mxu0 }
 0x3f7   :  { %v822_v24 = vadd.f32 %v821_v22, %v629_v16 }
 0x3f8   :  { %870 = vst.msk [vmem:[%s1975_s10 + $0x48] sm:$0xff] %vm860_vm4, %v827_v21 }
 0x3f9   :  { %869 = vst.msk [vmem:[%s1975_s10 + $0x40] sm:$0xff] %vm860_vm4, %v822_v24  ;;  %v1338_v26 = vpop.f32.mrb[16].mxu0 }
 0x3fa   :  { %v837_v27 = vadd.f32 %v1338_v26, %v644_v23  ;;  %v831_v28 = vpop.f32.mrb[17].mxu0 }
 0x3fb   :  { %v832_v29 = vadd.f32 %v831_v28, %v639_v25 }
 0x3fc   :  { %872 = vst.msk [vmem:[%s1975_s10 + $0x58] sm:$0xff] %vm860_vm4, %v837_v27 }
 0x3fd   :  { %871 = vst.msk [vmem:[%s1975_s10 + $0x50] sm:$0xff] %vm860_vm4, %v832_v29  ;;  %v1341_v31 = vpop.f32.mrb[18].mxu0 }
 0x3fe   :  { %v847_v33 = vadd.f32 %v1341_v31, %v654_v30  ;;  %v841_v34 = vpop.f32.mrb[19].mxu0 }
 0x3ff   :  { %v842_v35 = vadd.f32 %v841_v34, %v649_v32 }
 0x400   :  { %874 = vst.msk [vmem:[%s1975_s10 + $0x68] sm:$0xff] %vm860_vm4, %v847_v33 }
 0x401   :  { %873 = vst.msk [vmem:[%s1975_s10 + $0x60] sm:$0xff] %vm860_vm4, %v842_v35  ;;  %v1344_v36 = vpop.f32.mrb[20].mxu0 }
 0x402   :  { %v851_v37 = vpop.f32.mrb[21].mxu0 }
 0x405   :  { %v1052_v38 = vpop.f32.mrb[22].mxu0 }
 0x406   :  { %v1054_v39 = vpop.f32.mrb[23].mxu0  ;;  %v1063_v40 = vsel %vm1057_vm5, %v1052_v38, -inf  ;;  %v1058_v41 = vsel %vm1057_vm5, %v1052_v38, inf }
 0x407   :  { %v1059_v42 = vsel %vm1057_vm5, %v1054_v39, inf  ;;  %v1064_v43 = vsel %vm1057_vm5, %v1054_v39, -inf }
 0x408   :  { %v1065_v44 = vmax.f32 %v1063_v40, %v1064_v43  ;;  %v1060_v46 = vmin.f32 %v1058_v41, %v1059_v42 }
 0x40a   :  { %1066 = vmax.xlane.f32.xlu1 %v1065_v44  ;;  %1061 = vmin.xlane.f32.xlu0 %v1060_v46 }
 0x41b   :  { %663 = vperm.xlu1 %1512, %v585_v47  }
 0x420   :  { %658 = vperm.xlu0 %1511, %v584_v48  }
 0x497   :  { %v1067_v49 = vpop.xlane.xlu1 %1066  ;;  %v1062_v50 = vpop.xlane.xlu0 %1061 }
 0x498   :  { %v1070_v51 = vsub.f32 %v1067_v49, %v1062_v50  ;;  %v1068_v57 = vsub.f32 %v1052_v38, %v1062_v50  ;;  %v1069_v58 = vsub.f32 %v1054_v39, %v1062_v50 }
 0x49a   :  { %v1071_v52 = vadd.f32 1e-08, %v1070_v51 }
 0x49b   :  { %v664_v53 = vpop.permute.xlu1 %663 }
 0x49c   :  { %1515 = vrcp.f32 %v1071_v52  ;;  %v857_v54 = vadd.f32 %v1344_v36, %v664_v53 }
 0x49e   :  { %876 = vst.msk [vmem:[%s1975_s10 + $0x78] sm:$0xff] %vm860_vm4, %v857_v54 }
 0x49f   :  { %v659_v55 = vpop.permute.xlu0 %658 }
 0x4a0   :  { %v852_v56 = vadd.f32 %v851_v37, %v659_v55 }
 0x4a2   :  { %875 = vst.msk [vmem:[%s1975_s10 + $0x70] sm:$0xff] %vm860_vm4, %v852_v56 }
 0x4a6   :  { %v1516_v59 = vpop.eup %1515 }
 0x4a7   :  { %v1073_v60 = vmul.f32 %v1516_v59, %v1068_v57  ;;  %v1074_v61 = vmul.f32 %v1516_v59, %v1069_v58 }
 0x4a9   :  { %vm1075_vm6 = vcmp.gt.f32.partialorder %v1073_v60, 0.8  ;;  %vm1076_vm7 = vcmp.gt.f32.partialorder %v1074_v61, 0.8  ;;  %v1085_v62 = vcombine.low %v1073_v60, %v1074_v61 }
 0x4aa   :  { %v1077_v63 = vsel %vm1075_vm6, 1.0, %v1073_v60  ;;  %v1078_v0 = vsel %vm1076_vm7, 1.0, %v1074_v61 }
 0x4ab   :  { %vm1079_vm8 = vcmp.lt.f32.partialorder %v1077_v63, 0.8  ;;  %vm1080_vm9 = vcmp.lt.f32.partialorder %v1078_v0, 0.8 }
 0x4ac   :  { %1145 = vst.sshfl [vmem:[%s1976_s11] sm:$0x33 pattern:$0x76325410] %v1085_v62  ;;  %v1081_v1 = vsel %vm1079_vm8, 0.0, %v1077_v63  ;;  %v1082_v2 = vsel %vm1080_vm9, 0.0, %v1078_v0 }
 0x4ad   :  { %v1097_v3 = vcombine.low %v1081_v1, %v1082_v2 }
 0x4af   :  { %1146 = vst.sshfl [vmem:[%s1977_s12] sm:$0x33 pattern:$0x76325410] %v1097_v3 }
 0x4b0   :  { %1119 = vsyncpa [#allocation3], 1 }
 0x4b1   :  { %1120 = vsyncpa [#allocation5], 1 }
 0x4b2   :  { %1121 = vsyncpa [#allocation8], 1 }

</bundles_post_ra>
